<compile_context>
chip_gen: v5e
topology: v5e:2x2
jax: 0.10.0
libtpu: 0.0.40
codegen_flags: <defaults>
</compile_context>

<pallas_src>
import functools

import jax
import jax.numpy as jnp
from jax.experimental import pallas as pl
from jax.experimental.pallas import tpu as pltpu


def _ln_withbias_kernel(x_ref, w_ref, b_ref, o_ref, *, eps: float):
    # Block: (Bb, C, T).  C on sublanes, spatial (H*W) on lanes.
    x = x_ref[...].astype(jnp.float32)               # (Bb, C, T)
    w = w_ref[...].astype(jnp.float32)               # (C, 1) -> broadcasts
    b = b_ref[...].astype(jnp.float32)               # (C, 1)

    mu = jnp.mean(x, axis=1, keepdims=True)          # (Bb, 1, T)
    xc = x - mu
    var = jnp.mean(xc * xc, axis=1, keepdims=True)   # two-pass, unbiased=False
    inv = 1.0 / jnp.sqrt(var + eps)                  # precise sqrt + divide

    o_ref[...] = (xc * inv * w + b).astype(o_ref.dtype)


def _ln_biasfree_kernel(x_ref, w_ref, o_ref, *, eps: float):
    x = x_ref[...].astype(jnp.float32)               # (Bb, C, T)
    w = w_ref[...].astype(jnp.float32)               # (C, 1)

    mu = jnp.mean(x, axis=1, keepdims=True)
    xc = x - mu
    var = jnp.mean(xc * xc, axis=1, keepdims=True)
    inv = 1.0 / jnp.sqrt(var + eps)

    # BiasFree: x (NOT x - mu) is normalized; mu only enters through var.
    o_ref[...] = (x * inv * w).astype(o_ref.dtype)


def _max_lane_tile(c: int, in_itemsize: int, vmem_limit_bytes: int) -> int:
    """Largest lane extent per block that fits the VMEM budget (dtype-aware)."""
    # Per lane-column cost of one block "set":
    #   2x double-buffered input + 2x double-buffered output (same dtype as in)
    #   + ~2 block-sized f32 temporaries live inside the kernel (x_f32, xc/xc^2).
    per_lane = c * (4 * in_itemsize + 2 * 4)
    budget = (vmem_limit_bytes * 3) // 4             # headroom for compiler scratch
    t = max(128, budget // max(per_lane, 1))
    return int(min(t, 32768))                        # big tiles amortize step overhead


def layernorm_nchw(x, weight, bias, *, with_bias: bool, eps: float = 1e-5,
                   tile_hw: int | None = None,
                   vmem_limit_bytes: int = 32 * 1024 * 1024):
    """Restormer LayerNorm on NCHW input; normalizes over C. Returns NCHW."""
    B, C, H, W = x.shape
    HW = H * W
    x3 = x.reshape(B, C, HW)          # pure reshape: no transpose, no extra HBM pass

    max_lanes = _max_lane_tile(C, x.dtype.itemsize, vmem_limit_bytes)

    if tile_hw is not None:
        # Clip user-supplied tile against the same VMEM budget (v7x: 64 MiB VMEM).
        tile_hw = min(int(tile_hw), max_lanes, HW)
        if tile_hw < HW:
            tile_hw = max(128, (tile_hw // 128) * 128)   # (8,128) lane rule
        bb = 1
    elif HW <= max_lanes:
        # Whole spatial row per block (no ragged lane tail).  For small HW fold
        # several batch images per block, but keep >= ~4 grid steps when B allows
        # so both v7x TensorCores stay fed (dimension_semantics are "parallel").
        tile_hw = HW
        bb = min(B, max(1, max_lanes // max(HW, 1)), max(1, B // 4), 16)
        while B % bb:                  # keep blocks divisor-aligned (no batch tail)
            bb -= 1
    else:
        # Large HW: lane-tile in multiples of 128; last tile may be ragged
        # (padded reads / masked writes -- safe because all math is per-lane).
        tile_hw = (max_lanes // 128) * 128
        bb = 1

    grid = (pl.cdiv(B, bb), pl.cdiv(HW, tile_hw))

    x_spec = pl.BlockSpec((bb, C, tile_hw), lambda i, j: (i, 0, j))
    o_spec = pl.BlockSpec((bb, C, tile_hw), lambda i, j: (i, 0, j))
    wb_spec = pl.BlockSpec((C, 1), lambda i, j: (0, 0))

    if with_bias:
        kernel = functools.partial(_ln_withbias_kernel, eps=eps)
        in_specs = [x_spec, wb_spec, wb_spec]
        args = (x3, weight.reshape(C, 1), bias.reshape(C, 1))
    else:
        kernel = functools.partial(_ln_biasfree_kernel, eps=eps)
        in_specs = [x_spec, wb_spec]                 # no useless bias DMA
        args = (x3, weight.reshape(C, 1))

    y3 = pl.pallas_call(
        kernel,
        out_shape=jax.ShapeDtypeStruct((B, C, HW), x.dtype),
        grid_spec=pltpu.PrefetchScalarGridSpec(
            num_scalar_prefetch=0,
            grid=grid,
            in_specs=in_specs,
            out_specs=o_spec,
        ),
        compiler_params=pltpu.CompilerParams(
            dimension_semantics=("parallel", "parallel"),
            vmem_limit_bytes=vmem_limit_bytes,
        ),
    )(*args)

    return y3.reshape(B, C, H, W)


class LayerNormPallas:
    """Mirrors restormer.LayerNorm(dim, LayerNorm_type) forward on NCHW input."""

    def __init__(self, dim: int, layernorm_type: str):
        self.dim = dim
        self.with_bias = (layernorm_type != "BiasFree")
        # deterministic init, same as the nn.Module __init__:
        self.weight = jnp.ones((dim,), jnp.float32)
        self.bias = jnp.zeros((dim,), jnp.float32)

    def __call__(self, x, *, tile_hw: int | None = None):  # x: (B, C, H, W)
        assert x.shape[1] == self.dim
        return layernorm_nchw(x, self.weight, self.bias,
                              with_bias=self.with_bias, tile_hw=tile_hw)


def _ref_forward(x, weight, bias, with_bias, eps=1e-5):
    """Pure-JAX reference replicating the PyTorch module (NCHW in/out)."""
    xf = x.astype(jnp.float32)
    mu = jnp.mean(xf, axis=1, keepdims=True)
    var = jnp.mean((xf - mu) ** 2, axis=1, keepdims=True)
    w = weight.reshape(1, -1, 1, 1)
    if with_bias:
        y = (xf - mu) / jnp.sqrt(var + eps) * w + bias.reshape(1, -1, 1, 1)
    else:
        y = xf / jnp.sqrt(var + eps) * w
    return y.astype(x.dtype)


if __name__ == "__main__":
    key = jax.random.PRNGKey(0)
    k1, k2, k3 = jax.random.split(key, 3)
    ok = True

    # 1) Canonical small shape implied by the module (single block per image).
    x1 = jax.random.normal(k1, (2, 4, 16, 16), dtype=jnp.float32)
    # 2) Small-HW / larger-B: exercises the batch-folded (Bb, C, HW) block path.
    x2 = jax.random.normal(k2, (8, 4, 8, 8), dtype=jnp.float32)
    # 3) Spatial extent not a multiple of 128 (HW = 324): full-row block, no
    #    ragged lane tail, exercises the "block == full array dim" layout rule.
    x3 = jax.random.normal(k3, (2, 4, 18, 18), dtype=jnp.float32)

    for x in (x1, x2, x3):
        for ln_type in ("BiasFree", "WithBias"):
            mod = LayerNormPallas(x.shape[1], ln_type)
            out = jax.block_until_ready(mod(x))
            ref = _ref_forward(x, mod.weight, mod.bias, mod.with_bias)
            if out.shape != x.shape:
                ok = False
            if not bool(jnp.allclose(out, ref, atol=1e-4, rtol=1e-4)):
                ok = False

    print("KERNEL_OK" if ok else "KERNEL_MISMATCH")
</pallas_src>

<mosaic_0001>
module attributes {stable_mosaic.version = 11 : i64} {
  func.func @_ln_biasfree_kernel(%arg0: i32, %arg1: i32, %arg2: memref<1x4x256xf32, #tpu.memory_space<vmem>>, %arg3: memref<4x1xf32, #tpu.memory_space<vmem>>, %arg4: memref<1x4x256xf32, #tpu.memory_space<vmem>>) attributes {dimension_semantics = [#tpu.dimension_semantics<parallel>, #tpu.dimension_semantics<parallel>], iteration_bounds = array<i64: 2, 1>, scalar_prefetch = 0 : i64, scratch_operands = 0 : i64, tpu.core_type = #tpu.core_type<tc>, window_params = [{transform_indices = @transform_0, window_bounds = array<i64: 1, 4, 256>}, {pipeline_mode = #tpu.pipeline_mode<synchronous>, transform_indices = @transform_1, window_bounds = array<i64: 4, 1>}, {transform_indices = @transform_2, window_bounds = array<i64: 1, 4, 256>}]} {
    %c0 = arith.constant 0 : index
    %c0_0 = arith.constant 0 : index
    %c0_1 = arith.constant 0 : index
    %0 = vector.load %arg2[%c0, %c0_0, %c0_1] : memref<1x4x256xf32, #tpu.memory_space<vmem>>, vector<1x4x256xf32>
    %c0_2 = arith.constant 0 : index
    %c0_3 = arith.constant 0 : index
    %1 = vector.load %arg3[%c0_2, %c0_3] : memref<4x1xf32, #tpu.memory_space<vmem>>, vector<4x1xf32>
    %cst = arith.constant dense<0.000000e+00> : vector<1x256xf32>
    %2 = vector.multi_reduction <add>, %0, %cst [1] : vector<1x4x256xf32> to vector<1x256xf32>
    %3 = vector.shape_cast %2 : vector<1x256xf32> to vector<1x1x256xf32>
    %cst_4 = arith.constant 4.000000e+00 : f32
    %4 = vector.broadcast %cst_4 : f32 to vector<1x1x256xf32>
    %5 = arith.divf %3, %4 : vector<1x1x256xf32>
    %6 = vector.broadcast %5 : vector<1x1x256xf32> to vector<1x4x256xf32>
    %7 = arith.subf %0, %6 : vector<1x4x256xf32>
    %8 = arith.mulf %7, %7 : vector<1x4x256xf32>
    %cst_5 = arith.constant dense<0.000000e+00> : vector<1x256xf32>
    %9 = vector.multi_reduction <add>, %8, %cst_5 [1] : vector<1x4x256xf32> to vector<1x256xf32>
    %10 = vector.shape_cast %9 : vector<1x256xf32> to vector<1x1x256xf32>
    %cst_6 = arith.constant 4.000000e+00 : f32
    %11 = vector.broadcast %cst_6 : f32 to vector<1x1x256xf32>
    %12 = arith.divf %10, %11 : vector<1x1x256xf32>
    %cst_7 = arith.constant 9.99999974E-6 : f32
    %13 = vector.broadcast %cst_7 : f32 to vector<1x1x256xf32>
    %14 = arith.addf %12, %13 : vector<1x1x256xf32>
    %15 = math.sqrt %14 : vector<1x1x256xf32>
    %cst_8 = arith.constant 1.000000e+00 : f32
    %16 = vector.broadcast %cst_8 : f32 to vector<1x1x256xf32>
    %17 = arith.divf %16, %15 : vector<1x1x256xf32>
    %18 = vector.broadcast %17 : vector<1x1x256xf32> to vector<1x4x256xf32>
    %19 = arith.mulf %0, %18 : vector<1x4x256xf32>
    %20 = vector.shape_cast %1 : vector<4x1xf32> to vector<1x4x1xf32>
    %21 = vector.broadcast %20 : vector<1x4x1xf32> to vector<1x4x256xf32>
    %22 = arith.mulf %19, %21 : vector<1x4x256xf32>
    %c0_9 = arith.constant 0 : index
    %c0_10 = arith.constant 0 : index
    %c0_11 = arith.constant 0 : index
    %23 = vector.load %arg4[%c0_9, %c0_10, %c0_11] : memref<1x4x256xf32, #tpu.memory_space<vmem>>, vector<1x4x256xf32>
    tpu.vector_store %arg4[%c0_9, %c0_10, %c0_11], %22 {strides = array<i32>} : memref<1x4x256xf32, #tpu.memory_space<vmem>>, vector<1x4x256xf32>,
    return
  }
  func.func @transform_0(%arg0: i32, %arg1: i32) -> (i32, i32, i32) {
    %c0_i32 = arith.constant 0 : i32
    %c0_i32_0 = arith.constant 0 : i32
    return %arg0, %c0_i32, %arg1 : i32, i32, i32
  }
  func.func @transform_1(%arg0: i32, %arg1: i32) -> (i32, i32) {
    %c0_i32 = arith.constant 0 : i32
    %c0_i32_0 = arith.constant 0 : i32
    %c0_i32_1 = arith.constant 0 : i32
    return %c0_i32, %c0_i32_0 : i32, i32
  }
  func.func @transform_2(%arg0: i32, %arg1: i32) -> (i32, i32, i32) {
    %c0_i32 = arith.constant 0 : i32
    %c0_i32_0 = arith.constant 0 : i32
    return %arg0, %c0_i32, %arg1 : i32, i32, i32
  }
}

</mosaic_0001>

<bundles_post_ra>
// kernel: tpu_custom_call.1
= control target key start
LH: loop header
LB: loop body
LE: loop exit
PB: predicated region body
PF: predicated region fallthrough
CT: control target
= control target key end

     0   :  { %7 = vsyncpa [#allocation3], 0  ;;  %s782_s0 = inlined_call_operand.hbm [shape: f32[2,4,256], index: 0, kind: input, shape index: {}]   ;;  %s783_s1 = inlined_call_operand.vmem [shape: f32[4,1], index: 1, kind: input, shape index: {}]   ;;  %s784_s2 = inlined_call_operand.hbm [shape: f32[2,4,256], index: 2, kind: output, shape index: {}]  }
   0x1   :  { %9 = vsyncpa [#allocation3 + $0x1], 0 }
   0x2   :  { %10 = vsyncpa [#allocation4], 0 }
   0x3   :  { %12 = vsyncpa [#allocation4 + $0x1], 0  ;;  %s644_s9 = smov 0   ;;  %s646_s10 = smov 0  }
   0x4   :  { %s648_s11 = smov 0   ;;  %s650_s12 = smov 0  }
   0x5   :  { %s652_s13 = smov 0   ;;  %s654_s14 = smov 0  }
   0x6 LB: > { %s419_s15 = sadd.s32 4294967295, %s624_s14   ;;  %s420_s16 = sadd.s32 4294967294, %s624_s14   ;;  %s624_s14 = sphi %s654_s14, %s18_s14   ;;  %s620_s13 = sphi %s652_s13, %s793_s13   ;;  %s616_s12 = sphi %s650_s12, %s792_s12   ;;  %s612_s11 = sphi %s648_s11, %s791_s11   ;;  %s608_s10 = sphi %s646_s10, %s790_s10   ;;  %s604_s9 = sphi %s644_s9, %s789_s9  }
   0x7   : > { %s30_s17 = sadd.s32 1, %s620_s13  ;;  %s39_s18 = sadd.s32 1, %s612_s11 }
   0x8   : > { %p32_p0 = scmp.ge.s32.totalorder %s30_s17, 2  ;;  %p46_p1 = scmp.ne.s32.totalorder %s612_s11, %s608_s10 }
   0x9   : > { %p47_p2 = scmp.eq.s32.totalorder %s624_s14, 0  ;;  %p52_p3 = scmp.ne.s32.totalorder %s608_s10, %s604_s9 }
   0xa   : > { %s795_s17 = smov (%p32_p0, %s30_s17), 0  ;;  %p53_p5 = scmp.eq.s32.totalorder %s419_s15, 0 }
   0xb   : > { %p685_p4 = por %p47_p2, %p46_p1  ;;  %s34_s20 = ssub.s32 %s620_s13, %s795_s17 }
   0xc   : > { %p99_p6 = scmp.eq.s32.totalorder %s419_s15, 1  ;;  %p37_p7 = scmp.eq.s32.totalorder %s34_s20, 0 }
   0xd   : > { %p691_p8 = por %p53_p5, %p52_p3  ;;  %p105_p10 = scmp.eq.s32.totalorder %s420_s16, 1 }
   0xe   : > { %p695_p9 = por %p99_p6, %p46_p1  ;;  %p422_p12 = scmp.ge.s32.totalorder %s624_s14, 2 }
   0xf   : > { %s700_s23 = scalar_select %p37_p7, %s612_s11, %s39_s18  }
  0x10   : > { %p702_p11 = por %p105_p10, %p52_p3  ;;  %p448_p13 = scmp.lt.s32.totalorder %s624_s14, 2 }
  0x11   : > { %s128_s25 = sand.u32 1, %s612_s11   ;;  %s434_s27 = sshll.u32 %s620_s13, 3 }
  0x12   : > { %s423_s26 = sshll.u32 %s128_s25, 3  ;;  %s139_s30 = scalar_lea.hbm %s782_s0, %s434_s27 }
  0x13   : > { %s132_s3 = scalar_lea.vmem [#allocation2], %s423_s26  ;;  %s141_s5 = sshll.u32 %s139_s30, 4  ;;  %s142_s5 = int_to_ptr.hbm [resolvable:$true] %s141_s5 }
  0x14   : > { %s143_s4 = sshll.u32 %s132_s3, 4  ;;  %p441_p0 = pnand %p448_p13, %p685_p4  ;;  %s144_s4 = int_to_ptr.vmem [resolvable:$true] %s143_s4 }
  0x15   : > { %p426_p1 = scmp.ge.s32.totalorder %s624_s14, 1  ;;  %p148_p2 = scmp.lt.s32.totalorder %s624_s14, 3 }
  0x16   : > { %s129_s6 = scalar_lea.sflag [#allocation3], %s128_s25 }
  0x17   : > { %443 = dma.hbm_to_vmem [thread:$0]  (!%p441_p0), %s142_s5, 128, %s144_s4, %s129_s6  }
  0x18   : > { %p149_p3 = pnand %p426_p1, %p148_p2 }
  0x19   : > { %s718_s7 = sand.u32 (!%p149_p3), 1, %s608_s10  }
  0x1a   : > { %152 = sbr.rel (%p149_p3) target bundleno = 156 (0x9c), region = 28  ;;  %s427_s8 = sshll.u32 (!%p149_p3), %s718_s7, 3 }
  0x1b   : > { %s155_s15 = scalar_lea.sflag (!%p149_p3), [#allocation3], %s718_s7  ;;  %s158_s16 = scalar_lea.vmem (!%p149_p3), [#allocation2], %s427_s8 }
  0x1f   : > { %595 = dma.done.wait (%p691_p8), %s155_s15, 128  }
  0x20   : > { %597 = vsyncadd (%p691_p8), %s155_s15, 4294967168  ;;  %v626_v0 = vmov 0   ;;  %v627_v1 = vmov 4.0   ;;  %v183_v3 = vld [vmem:[%s783_s1] sm:$0xf]  ;;  %v731_v4 = vld [vmem:[%s158_s16] sm:$0xff] }
  0x21   : > { %501 = vset.pattern.permute.xlu0 %v626_v0  ;;  %502 = vrcp.f32 %v627_v1  ;;  %185 = vst [vmem:[#allocation1] ss:$2 sm:$0xff] %v731_v4  ;;  %vm190_vm0 = vcmask 1043456   ;;  %s435_s20 = sshll.u32 %s616_s12, 3  ;;  %s179_s27 = scalar_lea.vmem [#allocation5], %s427_s8 }
  0x22   : > { %307 = vperm.xlu0 %501, %v183_v3   ;;  %s330_s26 = scalar_lea.hbm %s784_s2, %s435_s20  ;;  %s332_s28 = sshll.u32 %s179_s27, 4  ;;  %s333_s28 = int_to_ptr.vmem [resolvable:$true] %s332_s28 }
  0x23   : > { %s334_s29 = sshll.u32 %s330_s26, 4  ;;  %s317_s12 = scalar_lea.sflag [#allocation4], %s718_s7  ;;  %s335_s29 = int_to_ptr.hbm [resolvable:$true] %s334_s29 }
  0x24   : > { %s556_s30 = sshra.s32 %s335_s29, 4  ;;  %s562_s6 = scalar_lea.hbm %s784_s2, 16  ;;  %s557_s30 = int_to_ptr.hbm [resolvable:$true] %s556_s30 }
  0x25   : > { %s558_s3 = scalar_lea.hbm %s557_s30, 8  ;;  %p563_p7 = scmp.lt.s32.totalorder %s557_s30, %s784_s2 }
  0x26   : > { %p559_p4 = scmp.ne.s32.totalorder %s557_s30, %s558_s3  ;;  %p564_p8 = scmp.lt.s32.totalorder %s562_s6, %s558_s3 }
  0x27   : > { %v503_v2 = vpop.eup %502 }
  0x28   : > { %v206_v5 = vmul.f32 4.0, %v503_v2  ;;  %v186_v7 = vld.sshfl [vmem:[#allocation1] sm:$0xff pattern:$0x75316420]  ;;  %vm210_vm1 = vweird.f32 %v503_v2  ;;  %p560_p5 = pnand %p559_p4, %p695_p9  ;;  %p565_p10 = por %p564_p8, %p563_p7 }
  0x29   : > { %v187_v8 = vld.sshfl [vmem:[#allocation1 + $0x8] sm:$0xff pattern:$0x75316420]  ;;  %v191_v9 = vsel %vm190_vm0, %v186_v7, 0.0 }
  0x2a   : > { %v207_v6 = vsub.f32 1.0, %v206_v5  ;;  %v198_v10 = vsel %vm190_vm0, %v187_v8, 0.0  ;;  %v192_v11 = vrot.slane %v191_v9, 4  ;;  %p561_p6 = pneg %p560_p5 }
  0x2b   : > { %v199_v12 = vrot.slane %v198_v10, 4 }
  0x2c   : > { %v208_v13 = vmul.f32 %v503_v2, %v207_v6  ;;  %v193_v14 = vadd.f32 %v192_v11, %v191_v9  ;;  %p566_p13 = pnand %p565_p10, %p561_p6 }
  0x2d   : > { %v200_v15 = vadd.f32 %v199_v12, %v198_v10 }
  0x2e   : > { %v194_v16 = vrot.slane %v193_v14, 2  ;;  %v209_v18 = vadd.f32 %v503_v2, %v208_v13 }
  0x2f   : > { %v201_v17 = vrot.slane %v200_v15, 2 }
  0x30   : > { %v195_v19 = vadd.f32 %v194_v16, %v193_v14  ;;  %v211_v23 = vsel %vm210_vm1, %v503_v2, %v209_v18 }
  0x31   : > { %v202_v20 = vadd.f32 %v201_v17, %v200_v15 }
  0x32   : > { %v196_v21 = vrot.slane %v195_v19, 1 }
  0x33   : > { %v203_v22 = vrot.slane %v202_v20, 1 }
  0x34   : > { %v197_v24 = vadd.f32 %v196_v21, %v195_v19 }
  0x35   : > { %v204_v25 = vadd.f32 %v203_v22, %v202_v20 }
  0x36   : > { %v212_v26 = vmul.f32 %v211_v23, %v197_v24 }
  0x37   : > { %v213_v27 = vmul.f32 %v211_v23, %v204_v25 }
  0x39   : > { %v216_v28 = vrot.slane %v213_v27, 4 }
  0x3b   : > { %v217_v29 = vsel %vm190_vm0, %v212_v26, %v216_v28 }
  0x3c   : > { %v219_v30 = vsub.f32 %v731_v4, %v217_v29  ;;  %v628_v29 = vmov 839922192  }
  0x3e   : > { %v220_v31 = vmul.f32 %v219_v30, %v219_v30  ;;  %v310_v30 = vunpack.c.l.s4 %v628_v29 }
  0x40   : > { %222 = vst [vmem:[#allocation1] ss:$2 sm:$0xff] %v220_v31 }
  0x47   : > { %v223_v32 = vld.sshfl [vmem:[#allocation1] sm:$0xff pattern:$0x75316420]  ;;  %v224_v33 = vld.sshfl [vmem:[#allocation1 + $0x8] sm:$0xff pattern:$0x75316420] }
  0x48   : > { %v227_v34 = vsel %vm190_vm0, %v223_v32, 0.0  ;;  %v234_v35 = vsel %vm190_vm0, %v224_v33, 0.0  ;;  %v311_v33 = vunpack.c.0.s8 %v310_v30 }
  0x49   : > { %v228_v36 = vrot.slane %v227_v34, 4  ;;  %v235_v37 = vrot.slane %v234_v35, 4 }
  0x4b   : > { %v229_v38 = vadd.f32 %v228_v36, %v227_v34  ;;  %v236_v39 = vadd.f32 %v235_v37, %v234_v35 }
  0x4d   : > { %v230_v40 = vrot.slane %v229_v38, 2  ;;  %v237_v41 = vrot.slane %v236_v39, 2 }
  0x4f   : > { %v231_v42 = vadd.f32 %v230_v40, %v229_v38  ;;  %v238_v43 = vadd.f32 %v237_v41, %v236_v39 }
  0x51   : > { %v232_v44 = vrot.slane %v231_v42, 1  ;;  %v239_v45 = vrot.slane %v238_v43, 1 }
  0x53   : > { %v233_v46 = vadd.f32 %v232_v44, %v231_v42  ;;  %v240_v47 = vadd.f32 %v239_v45, %v238_v43 }
  0x55   : > { %v241_v48 = vmul.f32 %v233_v46, %v211_v23  ;;  %v242_v49 = vmul.f32 %v240_v47, %v211_v23 }
  0x57   : > { %v243_v50 = vadd.f32 1e-05, %v241_v48  ;;  %v244_v51 = vadd.f32 1e-05, %v242_v49 }
  0x59   : > { %504 = vrsqrt.f32 %v243_v50  ;;  %vm252_vm2 = vcmp.eq.f32.partialorder %v243_v50, inf  ;;  %v255_v1 = vand.u32 2147483648, %v243_v50  ;;  %vm264_vm3 = vcmp.eq.f32.partialorder %v244_v51, inf }
  0x5a   : > { %506 = vrsqrt.f32 %v244_v51  ;;  %v267_v2 = vand.u32 2147483648, %v244_v51  ;;  %vm254_vm4 = vcmp.eq.f32.partialorder %v243_v50, 0.0  ;;  %vm266_vm5 = vcmp.eq.f32.partialorder %v244_v51, 0.0 }
  0x5f   : > { %v505_v52 = vpop.eup %504 }
  0x60   : > { %v507_v53 = vpop.eup %506  ;;  %v246_v54 = vmul.f32 %v505_v52, %v243_v50 }
  0x61   : > { %v258_v55 = vmul.f32 %v507_v53, %v244_v51 }
  0x62   : > { %v247_v56 = vmul.f32 %v505_v52, %v246_v54 }
  0x63   : > { %v259_v57 = vmul.f32 %v507_v53, %v258_v55 }
  0x64   : > { %v248_v58 = vmul.f32 0.5, %v247_v56 }
  0x65   : > { %v260_v59 = vmul.f32 0.5, %v259_v57 }
  0x66   : > { %v249_v60 = vsub.f32 1.5, %v248_v58 }
  0x67   : > { %v261_v61 = vsub.f32 1.5, %v260_v59 }
  0x68   : > { %v250_v62 = vmul.f32 %v505_v52, %v249_v60 }
  0x69   : > { %v262_v63 = vmul.f32 %v507_v53, %v261_v61 }
  0x6a   : > { %v251_v0 = vmul.f32 %v250_v62, %v243_v50 }
  0x6b   : > { %v263_v3 = vmul.f32 %v262_v63, %v244_v51 }
  0x6c   : > { %v253_v5 = vsel %vm252_vm2, %v243_v50, %v251_v0 }
  0x6d   : > { %v265_v6 = vsel %vm264_vm3, %v244_v51, %v263_v3  ;;  %v256_v7 = vsel %vm254_vm4, %v255_v1, %v253_v5 }
  0x6e   : > { %v268_v8 = vsel %vm266_vm5, %v267_v2, %v265_v6  ;;  %vm274_vm9 = vweird.f32 %v256_v7  ;;  %v280_v20 = vand.u32 2147483648, %v256_v7  ;;  %v278_v23 = vand.u32 2147483647, %v256_v7 }
  0x6f   : > { %508 = vrcp.f32 %v268_v8  ;;  %vm289_vm6 = vweird.f32 %v268_v8  ;;  %v295_v16 = vand.u32 2147483648, %v268_v8  ;;  %v293_v19 = vand.u32 2147483647, %v268_v8 }
  0x70   : > { %510 = vrcp.f32 %v256_v7  ;;  %v281_v25 = vor.u32 1.1754944e-38, %v280_v20  ;;  %vm279_vm13 = vcmp.eq.f32.partialorder %v278_v23, 8.507059e+37 }
  0x71   : > { %v296_v21 = vor.u32 1.1754944e-38, %v295_v16  ;;  %vm294_vm11 = vcmp.eq.f32.partialorder %v293_v19, 8.507059e+37 }
  0x75   : > { %v509_v9 = vpop.eup %508 }
  0x76   : > { %v285_v10 = vmul.f32 %v509_v9, %v268_v8  ;;  %v511_v11 = vpop.eup %510  ;;  %vm290_vm7 = vweird.f32 %v509_v9 }
  0x77   : > { %v270_v12 = vmul.f32 %v511_v11, %v256_v7  ;;  %vm291_vm8 = vmor %vm289_vm6, %vm290_vm7  ;;  %vm275_vm10 = vweird.f32 %v511_v11 }
  0x78   : > { %v286_v13 = vsub.f32 1.0, %v285_v10  ;;  %vm276_vm12 = vmor %vm274_vm9, %vm275_vm10 }
  0x79   : > { %v271_v14 = vsub.f32 1.0, %v270_v12 }
  0x7a   : > { %v287_v15 = vmul.f32 %v509_v9, %v286_v13 }
  0x7b   : > { %v272_v17 = vmul.f32 %v511_v11, %v271_v14 }
  0x7c   : > { %v288_v18 = vadd.f32 %v509_v9, %v287_v15 }
  0x7d   : > { %v273_v22 = vadd.f32 %v511_v11, %v272_v17 }
  0x7e   : > { %v292_v24 = vsel %vm291_vm8, %v509_v9, %v288_v18 }
  0x7f   : > { %v297_v26 = vsel %vm294_vm11, %v296_v21, %v292_v24  ;;  %v277_v27 = vsel %vm276_vm12, %v511_v11, %v273_v22 }
  0x80   : > { %v301_v28 = vrot.slane %v297_v26, 4  ;;  %v282_v31 = vsel %vm279_vm13, %v281_v25, %v277_v27 }
  0x82   : > { %v302_v32 = vsel %vm190_vm0, %v282_v31, %v301_v28 }
  0x83   : > { %v304_v34 = vmul.f32 %v302_v32, %v731_v4 }
  0x94   : > { %v308_v35 = vpop.permute.xlu0 %307 }
  0x95   : > { %v312_v36 = vperm.slane %v308_v35, %v311_v33 }
  0x97   : > { %v314_v37 = vmul.f32 %v312_v36, %v304_v34 }
  0x99   : > { %315 = vst [vmem:[%s179_s27] sm:$0xff] %v314_v37 }
  0x9a   : > { %569 = shalt.err (!%p566_p13)
}
  0x9b   : > { %438 = dma.vmem_to_hbm [thread:$0]  (%p695_p9), %s333_s28, 128, %s335_s29, %s317_s12  }
  0x9c PF: > { %s346_s7 = sand.u32 1, %s604_s9   ;;  %p445_p0 = pnand %p422_p12, %p702_p11 }
  0x9d   : > { %s347_s16 = scalar_lea.sflag [#allocation4], %s346_s7 }
  0x9e   : > { %p446_p1 = pneg %p445_p0 }
  0xa0   : > { %599 = dma.done.wait (%p446_p1), %s347_s16, 128  }
  0xa1   : > { %601 = vsyncadd (%p446_p1), %s347_s16, 4294967168  ;;  %s18_s14 = sadd.s32 1, %s624_s14   ;;  %s789_s9 = smov %s608_s10 }
  0xa2   : > { %p15_p2 = scmp.ge.s32.totalorder %s18_s14, 4   ;;  %s790_s10 = smov %s612_s11 }
  0xa3   : > { %s791_s11 = smov %s700_s23  ;;  %s792_s12 = smov %s620_s13 }
  0xa4   : > { %s793_s13 = smov %s795_s17  ;;  %17 = sbr.rel (!%p15_p2) target bundleno = 6 (0x6), region = 73 }
  0xa9   :  { %353 = vsyncpa [#allocation3], 1 }
  0xaa   :  { %355 = vsyncpa [#allocation3 + $0x1], 1 }
  0xab   :  { %356 = vsyncpa [#allocation4], 1 }
  0xac   :  { %358 = vsyncpa [#allocation4 + $0x1], 1 }

</bundles_post_ra>
